<compile_context>
chip_gen: v6e
topology: v6e:2x2x1
jax: 0.10.0
libtpu: 0.0.40
codegen_flags: <defaults>
</compile_context>

<pallas_src>
import numpy as np
from functools import partial

import jax
import jax.numpy as jnp
from jax.experimental import pallas as pl
from jax.experimental.pallas import tpu as pltpu


# ----------------------------- configs ---------------------------------------
class Configs:
    taskname = "long_term_forecast"
    pretrain = False
    window_size = 16
    label_len = 8
    pred_len = 8
    enc_in = 4
    c_out = 4
    d_model = 32
    n_heads = 4
    d_ff = 32
    e_layers = 1
    d_layers = 1
    top_k = 2
    factor = 1
    dropout = 0.0          # eval mode: dropout is a no-op
    embed = "timeF"        # TimeFeatureEmbedding (bias-free linear), freq 'h' -> 4 features
    freq = "h"
    output_attention = False
    activation = "relu"
    num_class = 4


MATMUL_DTYPE = jnp.bfloat16   # MXU-native operand dtype on v5e/v6e/v7x (accumulate in f32)


# ----------------------------- small helpers ----------------------------------
def positional_embedding(T, d_model):
    position = np.arange(T, dtype=np.float32)[:, None]
    div_term = np.exp(np.arange(0, d_model, 2, dtype=np.float32)
                      * -(np.log(10000.0) / d_model))
    pe = np.zeros((T, d_model), np.float32)
    pe[:, 0::2] = np.sin(position * div_term)
    pe[:, 1::2] = np.cos(position * div_term)
    return jnp.asarray(pe)


def _ln_val(v, g, b, eps=1e-5):
    """LayerNorm over the last dim of an in-kernel value (element-wise math kept in f32)."""
    mu = jnp.mean(v, axis=-1, keepdims=True)
    vc = v - mu
    var = jnp.mean(vc * vc, axis=-1, keepdims=True)
    return vc * jax.lax.rsqrt(var + eps) * g + b


def _bt2(v):
    """Transpose the last two dims of a (B, M, N) value via per-batch 2D transposes."""
    return jnp.stack([v[bb].T for bb in range(v.shape[0])], axis=0)


def _conv3x3_cl(v_cl, wf, bias):
    """3x3 stride-1 'same' conv on a channel-last in-kernel value.
    In-kernel halo pad + ONE im2col matmul (single deep MXU push).
    v_cl: (B,H,W,Cin); wf: (9*Cin, Cout) rows ordered (dh, dw, cin); bias: (1, Cout).
    Returns (B*H*W, Cout) f32."""
    Bv, Hv, Wv, Cin = v_cl.shape
    zr = jnp.zeros((Bv, 1, Wv, Cin), jnp.float32)
    vp = jnp.concatenate([zr, v_cl, zr], axis=1)                 # (B, H+2, W, Cin)
    zc = jnp.zeros((Bv, Hv + 2, 1, Cin), jnp.float32)
    vp = jnp.concatenate([zc, vp, zc], axis=2)                   # (B, H+2, W+2, Cin)
    patches = [vp[:, dh:dh + Hv, dw:dw + Wv, :].reshape(Bv * Hv * Wv, Cin)
               for dh in range(3) for dw in range(3)]
    cols = jnp.concatenate(patches, axis=-1)                     # (B*H*W, 9*Cin)
    return jnp.dot(cols.astype(MATMUL_DTYPE), wf,
                   preferred_element_type=jnp.float32) + bias


# ----------------------------- fused prologue kernel --------------------------
def prologue_embed(x_enc, x_mark_enc, params, cfg):
    """Instance-norm + DataEmbedding (token conv1d circular + timeF linear fused into one
    matmul + PE) + predict_linear over time -- one Pallas call, no in-kernel transposes."""
    B, T, C = x_enc.shape
    D = cfg.d_model
    total = cfg.window_size + cfg.pred_len
    Fm = x_mark_enc.shape[-1]

    def kernel(x_ref, xm_ref, ew_ref, pe_ref, pw_ref, pb_ref,
               o_ref, mean_ref, std_ref):
        x = x_ref[...]                                           # (B, T, C)
        mu = jnp.mean(x, axis=1, keepdims=True)                  # (B, 1, C)
        xc = x - mu
        var = jnp.mean(xc * xc, axis=1, keepdims=True)           # population var (unbiased=False)
        std = jnp.sqrt(var + 1e-5)
        xn = xc / std
        mean_ref[...] = mu
        std_ref[...] = std

        # circular pad + im2col for Conv1d(C, D, k=3, circular, bias-free), fused with the
        # timeF linear: ONE matmul over [(3 conv taps) ; (Fm time features)].
        xp = jnp.concatenate([xn[:, T - 1:T, :], xn, xn[:, 0:1, :]], axis=1)       # (B, T+2, C)
        cols = jnp.concatenate([xp[:, 0:T, :], xp[:, 1:T + 1, :], xp[:, 2:T + 2, :]],
                               axis=-1)                                            # (B, T, 3C)
        feats = jnp.concatenate([cols, xm_ref[...]], axis=-1)                      # (B, T, 3C+Fm)
        emb = jnp.dot(feats.reshape(B * T, 3 * C + Fm).astype(MATMUL_DTYPE), ew_ref[...],
                      preferred_element_type=jnp.float32).reshape(B, T, D)
        emb = emb + pe_ref[...][None]                                              # + PE

        # predict_linear over the time axis: per-batch (total, T) @ (T, D); D stays lane-minor.
        w = pw_ref[...]
        outs = [jnp.dot(w, emb[bb].astype(MATMUL_DTYPE),
                        preferred_element_type=jnp.float32) + pb_ref[...]
                for bb in range(B)]
        o_ref[...] = jnp.stack(outs, axis=0)                                       # (B, total, D)

    out_shapes = (jax.ShapeDtypeStruct((B, total, D), jnp.float32),
                  jax.ShapeDtypeStruct((B, 1, C), jnp.float32),
                  jax.ShapeDtypeStruct((B, 1, C), jnp.float32))
    return pl.pallas_call(kernel, out_shape=out_shapes)(
        x_enc.astype(jnp.float32), x_mark_enc.astype(jnp.float32),
        params["emb_w"], params["pe"], params["pred_w"], params["pred_b"])


# ----------------------------- kernel A: conv_resize + mask + NCHW flatten ------
def resize_mask_to_nchw(x, masks, rw, rb, H, W, length):
    """Fused: time pad -> 3x3 conv_resize (high|middle in one matmul) -> masking ->
    channel-first flatten.  Output (2B, N, H*W) whose flat buffer equals the reference's
    NCHW layout, so the (2B, H*W, N) encoder tokens are a free (contiguous) XLA reshape."""
    B, T, N = x.shape
    use_mask = masks is not None

    def kernel(*refs):
        if use_mask:
            x_ref, m_ref, rw_ref, rb_ref, o_ref = refs
        else:
            x_ref, rw_ref, rb_ref, o_ref = refs
        xv = x_ref[...]
        if length > T:
            xv = jnp.concatenate(
                [xv, jnp.zeros((B, length - T, N), jnp.float32)], axis=1)
        x_cl = xv.reshape(B, H, W, N)                            # channel-last grid
        hm = _conv3x3_cl(x_cl, rw_ref[...], rb_ref[...])         # (B*H*W, 2N)
        hm = hm.reshape(B, H * W, 2 * N)
        high = hm[:, :, :N]
        mid = hm[:, :, N:]
        if use_mask:
            m = m_ref[...]                                       # (2, H*W, 1)
            high = high * m[0][None]
            mid = mid * m[1][None]
        # raw NCHW flatten of each stream (matches torch .permute(0,3,1,2) memory layout)
        hi_t = _bt2(high)                                        # (B, N, H*W)
        mi_t = _bt2(mid)
        o_ref[...] = jnp.concatenate([hi_t, mi_t], axis=0)       # (2B, N, H*W)

    args = [x.astype(jnp.float32)]
    if use_mask:
        args.append(masks.astype(jnp.float32))
    args += [rw, rb]
    return pl.pallas_call(
        kernel, out_shape=jax.ShapeDtypeStruct((2 * B, N, H * W), jnp.float32)
    )(*args)


# ----------------------------- kernel B: whole encoder stack --------------------
def fused_encoder(tokens, enc_params, n_heads, activation):
    """ALL encoder layers + the encoder's final LayerNorm in ONE pallas_call.
    Fused QKV matmul; per-head softmax attention; single concatenated out-projection."""
    BB, L, D = tokens.shape
    Hh = n_heads
    E = D // Hh
    scale = 1.0 / float(np.sqrt(E))
    layers = enc_params["layers"]
    nl = len(layers)

    def _act(v):
        if activation == "relu":
            return jnp.maximum(v, 0.0)
        # tanh-approx GELU (avoids erf lowering); inactive with activation='relu'
        return 0.5 * v * (1.0 + jnp.tanh(0.7978845608028654 * (v + 0.044715 * v * v * v)))

    def kernel(*refs):
        x_ref = refs[0]
        lrefs = [refs[1 + i * 12: 1 + (i + 1) * 12] for i in range(nl)]
        gf_ref, bf_ref = refs[1 + nl * 12], refs[2 + nl * 12]
        o_ref = refs[3 + nl * 12]

        x2 = x_ref[...].reshape(BB * L, D)
        for (wqkv, bqkv, wo, bo, g1, b1, w1, bf1, w2, bf2, g2, b2) in lrefs:
            qkv = jnp.dot(x2.astype(MATMUL_DTYPE), wqkv[...],
                          preferred_element_type=jnp.float32) + bqkv[...]
            heads = []
            for h in range(Hh):
                qh = qkv[:, h * E:(h + 1) * E].reshape(BB, L, E)
                kh = qkv[:, D + h * E:D + (h + 1) * E].reshape(BB, L, E)
                vh = qkv[:, 2 * D + h * E:2 * D + (h + 1) * E].reshape(BB, L, E)
                s = jnp.einsum('ble,bme->blm', qh.astype(MATMUL_DTYPE),
                               kh.astype(MATMUL_DTYPE),
                               preferred_element_type=jnp.float32) * scale
                s = s - jnp.max(s, axis=-1, keepdims=True)
                p = jnp.exp(s)
                p = p / jnp.sum(p, axis=-1, keepdims=True)       # exact softmax denom
                oh = jnp.einsum('blm,bme->ble', p.astype(MATMUL_DTYPE),
                                vh.astype(MATMUL_DTYPE),
                                preferred_element_type=jnp.float32)
                heads.append(oh.reshape(BB * L, E))
            ctx = jnp.concatenate(heads, axis=-1)                # (BB*L, D)
            attn = jnp.dot(ctx.astype(MATMUL_DTYPE), wo[...],    # single out-projection
                           preferred_element_type=jnp.float32) + bo[...]
            x1 = _ln_val(x2 + attn, g1[...], b1[...])            # norm1(x + attn)
            yff = jnp.dot(x1.astype(MATMUL_DTYPE), w1[...],
                          preferred_element_type=jnp.float32) + bf1[...]
            yff = _act(yff)
            yff = jnp.dot(yff.astype(MATMUL_DTYPE), w2[...],
                          preferred_element_type=jnp.float32) + bf2[...]
            x2 = _ln_val(x1 + yff, g2[...], b2[...])             # norm2(x + ffn)
        y = _ln_val(x2, gf_ref[...], bf_ref[...])                # encoder final LayerNorm
        o_ref[...] = y.reshape(BB, L, D)

    args = [tokens]
    for lp in layers:
        args += [lp["wqkv"], lp["bqkv"], lp["wo"], lp["bo"],
                 lp["norm1_g"], lp["norm1_b"], lp["ff1_w"], lp["ff1_b"],
                 lp["ff2_w"], lp["ff2_b"], lp["norm2_g"], lp["norm2_b"]]
    args += [enc_params["norm_g"], enc_params["norm_b"]]
    return pl.pallas_call(
        kernel, out_shape=jax.ShapeDtypeStruct((BB, L, D), jnp.float32)
    )(*args)


# --------------- kernel C: conv_resizeback (+ fused block epilogue) -------------
def resizeback_from_nchw(y_cf, bw, bb_, H, W, T, epilogue=None):
    """Fused: channel-first -> channel-last transpose + 3x3 conv_resizeback + truncation.
    For the LAST period, `epilogue=(prev_res_list, x, pw_kb, ln_g, ln_b)` additionally fuses
    the weighted period residual + the TMAE block LayerNorm (weights read from SMEM)."""
    BB2, N, HW = y_cf.shape
    B = BB2 // 2
    has_epi = epilogue is not None
    if has_epi:
        prev_res, x_in, pw_kb, ln_g, ln_b = epilogue
        n_prev = len(prev_res)
        K = pw_kb.shape[0]

    def kernel(*refs):
        y_ref, w_ref, b_ref = refs[0], refs[1], refs[2]
        if has_epi:
            pw_ref = refs[3]
            pr_refs = refs[4:4 + n_prev]
            x_ref, g_ref, be_ref = refs[4 + n_prev], refs[5 + n_prev], refs[6 + n_prev]
            o_ref = refs[7 + n_prev]
        else:
            o_ref = refs[3]

        cl = _bt2(y_ref[...])                                    # (2B, HW, N) channel-last
        back_in = jnp.concatenate([cl[:B], cl[B:]], axis=-1)     # (B, HW, 2N): [high ; middle]
        back_in = back_in.reshape(B, H, W, 2 * N)
        out = _conv3x3_cl(back_in, w_ref[...], b_ref[...])       # (B*H*W, N)
        res_k = out.reshape(B, H * W, N)[:, :T, :]               # (B, T, N)

        if not has_epi:
            o_ref[...] = res_k
        else:
            # out = LayerNorm(x + sum_k pw[k,b] * res_k) ; per-(k,b) weights from SMEM
            for bb in range(B):
                acc = x_ref[bb] + res_k[bb] * pw_ref[K - 1, bb]
                for k in range(n_prev):
                    acc = acc + pr_refs[k][bb] * pw_ref[k, bb]
                o_ref[bb] = _ln_val(acc, g_ref[...], be_ref[...])

    if not has_epi:
        return pl.pallas_call(
            kernel, out_shape=jax.ShapeDtypeStruct((B, T, N), jnp.float32)
        )(y_cf, bw, bb_)

    vm = pl.BlockSpec(memory_space=pltpu.MemorySpace.VMEM)
    sm = pl.BlockSpec(memory_space=pltpu.MemorySpace.SMEM)
    return pl.pallas_call(
        kernel,
        in_specs=[vm, vm, vm, sm] + [vm] * n_prev + [vm, vm, vm],
        out_specs=vm,
        out_shape=jax.ShapeDtypeStruct((B, T, N), jnp.float32),
    )(y_cf, bw, bb_, pw_kb.astype(jnp.float32), *prev_res,
      x_in.astype(jnp.float32), ln_g, ln_b)


# ----------------------------- projection + de-normalization -------------------
def project_denorm(x, w, b, std, mean):
    B, T, D = x.shape
    C = w.shape[1]

    def kernel(x_ref, w_ref, b_ref, s_ref, m_ref, o_ref):
        y = jnp.dot(x_ref[...].reshape(B * T, D).astype(MATMUL_DTYPE), w_ref[...],
                    preferred_element_type=jnp.float32) + b_ref[...]
        y = y.reshape(B, T, C)
        o_ref[...] = y * s_ref[...] + m_ref[...]

    return pl.pallas_call(
        kernel, out_shape=jax.ShapeDtypeStruct((B, T, C), jnp.float32)
    )(x, w, b, std, mean)


# ----------------------------- masking (device-side, XLA) ----------------------
def _make_mask(key, H, W, mask_size=(3, 3), num_masked=5):
    """Spatial mask for mask_specific_size; only built when H<=3 and W<=3 (same early-out
    as the reference).  Returned flattened as (H*W, 1) for the channel-last multiply."""
    mH, mW = mask_size
    nrH, nrW = H - mH + 1, W - mW + 1
    total = nrH * nrW
    nm = min(num_masked, total)
    # TODO(synk): reference uses an unseeded torch.randperm; a key-derived JAX permutation is used.
    idx = jax.random.permutation(key, total)[:nm]
    hh = idx // nrW
    ww = idx % nrW
    rows = jax.lax.broadcasted_iota(jnp.int32, (H, W), 0)
    cols = jax.lax.broadcasted_iota(jnp.int32, (H, W), 1)
    mask = jnp.ones((H, W), jnp.float32)
    for i in range(nm):
        hit = (rows >= hh[i]) & (rows < hh[i] + mH) & (cols >= ww[i]) & (cols < ww[i] + mW)
        mask = jnp.where(hit, 0.0, mask)
    return mask.reshape(H * W, 1)


# ----------------------------- TimesMaskingBlock (static-shape part) -----------
def _block_apply(block_params, ln_g, ln_b, x, amp_mean, key, periods, top_idx, cfg):
    B, T, N = x.shape            # T = window + pred, N = d_model
    K = len(periods)
    pw = jax.nn.softmax(jnp.take(amp_mean, jnp.asarray(top_idx, jnp.int32), axis=1), axis=1)
    pw_kb = jnp.transpose(pw)                                    # (K, B)

    res_prev = []
    out = None
    for i, period in enumerate(periods):
        length = T if T % period == 0 else (T // period + 1) * period
        H, W = length // period, period

        masks = None
        if H <= 3 and W <= 3 and (H - 2) >= 1 and (W - 2) >= 1:
            k1, k2 = jax.random.split(jax.random.fold_in(key, i))
            masks = jnp.stack([_make_mask(k1, H, W), _make_mask(k2, H, W)], axis=0)

        # TODO(synk): conv_resize / conv_resizeback class definitions are not provided in the
        # source; shape-preserving 3x3 'same' convs are used as the multi-scale stand-in.
        nchw = resize_mask_to_nchw(x, masks, block_params["resize_w"],
                                   block_params["resize_b"], H, W, length)  # (2B, N, HW)
        # free (contiguous) reshape: the NCHW buffer viewed as raw (2B, HW, N) encoder tokens
        tokens = nchw.reshape(2 * B, H * W, N)
        enc_out = fused_encoder(tokens, block_params["encoder"], cfg.n_heads, cfg.activation)
        # free (contiguous) reshape back to the NCHW buffer
        enc_cf = enc_out.reshape(2 * B, N, H * W)

        if i < K - 1:
            res_prev.append(resizeback_from_nchw(enc_cf, block_params["back_w"],
                                                 block_params["back_b"], H, W, T))
        else:
            out = resizeback_from_nchw(enc_cf, block_params["back_w"],
                                       block_params["back_b"], H, W, T,
                                       epilogue=(res_prev, x, pw_kb, ln_g, ln_b))
    return out


# ----------------------------- full forward -----------------------------------
def build_model(cfg):
    total = cfg.window_size + cfg.pred_len

    @jax.jit
    def prologue(params, x_enc, x_mark_enc):
        return prologue_embed(x_enc, x_mark_enc, params, cfg)

    @jax.jit
    def fft_stats(x):
        xf = jnp.fft.rfft(x.astype(jnp.float32), axis=1)
        amp = jnp.abs(xf)
        freq = amp.mean(0).mean(-1)
        freq = freq.at[0].set(0.0)
        return freq, amp.mean(-1)

    @partial(jax.jit, static_argnames=("periods", "top_idx"))
    def block_step(block_params, ln_g, ln_b, x, amp_mean, key, *, periods, top_idx):
        return _block_apply(block_params, ln_g, ln_b, x, amp_mean, key, periods, top_idx, cfg)

    @jax.jit
    def head(params, enc_out, means, stdev):
        dec = project_denorm(enc_out, params["proj_w"], params["proj_b"], stdev, means)
        return dec[:, -cfg.pred_len:, :]

    def forward(params, x_enc, x_mark_enc, x_dec=None, x_mark_dec=None):
        enc_out, means, stdev = prologue(params, x_enc, x_mark_enc)
        mask_key = jax.random.PRNGKey(42)
        for i in range(cfg.e_layers):
            freq, amp_mean = fft_stats(enc_out)
            # one host sync per block: data-dependent period selection (mirrors .cpu().numpy())
            tops = [int(t) for t in np.asarray(jax.lax.top_k(freq, cfg.top_k)[1])]
            periods = tuple(max(1, total // max(1, t)) for t in tops)
            top_idx = tuple(tops)
            enc_out = block_step(params["blocks"][i], params["ln_g"], params["ln_b"],
                                 enc_out, amp_mean, jax.random.fold_in(mask_key, i),
                                 periods=periods, top_idx=top_idx)
        return head(params, enc_out, means, stdev)

    return forward


# ----------------------------- deterministic params ---------------------------
def init_params(cfg, key):
    D, C, Fd = cfg.d_model, cfg.enc_in, cfg.d_ff
    total = cfg.window_size + cfg.pred_len
    kit = iter(jax.random.split(key, 512))

    def rnd(shape, dtype=MATMUL_DTYPE):     # matmul weights stored in bf16 (MXU-native)
        return (jax.random.normal(next(kit), shape, jnp.float32) * 0.02).astype(dtype)

    def zeros(shape):
        return jnp.zeros(shape, jnp.float32)

    def ones(shape):
        return jnp.ones(shape, jnp.float32)

    params = {
        # fused [TokenEmbedding Conv1d(C, D, k=3, circular, bias-free) ; TimeFeatureEmbedding]
        # rows: 3 conv taps x C channels, then 4 timeF features
        "emb_w": rnd((3 * C + 4, D)),
        "pe": positional_embedding(cfg.window_size, D),
        "pred_w": rnd((total, cfg.window_size)),      # Linear(window, total) weight (torch layout)
        "pred_b": zeros((total, 1)),
        "ln_g": ones((1, D)), "ln_b": zeros((1, D)),
        "proj_w": rnd((D, cfg.c_out)), "proj_b": zeros((1, cfg.c_out)),
        "blocks": [],
    }
    for _ in range(cfg.e_layers):
        enc_layers = []
        for _ in range(cfg.e_layers):   # reference: each block's Encoder has e_layers layers
            enc_layers.append(dict(
                wqkv=rnd((D, 3 * D)), bqkv=zeros((1, 3 * D)),     # fused [Wq|Wk|Wv]
                wo=rnd((D, D)), bo=zeros((1, D)),
                norm1_g=ones((1, D)), norm1_b=zeros((1, D)),
                ff1_w=rnd((D, Fd)), ff1_b=zeros((1, Fd)),
                ff2_w=rnd((Fd, D)), ff2_b=zeros((1, D)),
                norm2_g=ones((1, D)), norm2_b=zeros((1, D)),
            ))
        blk = dict(
            # fused [high|middle] 3x3 convs: rows ordered (dh, dw, cin), cols = 2*d_model
            resize_w=rnd((9 * D, 2 * D)), resize_b=zeros((1, 2 * D)),
            # fused resizeback conv on concatenated [high; middle] channels
            back_w=rnd((9 * 2 * D, D)), back_b=zeros((1, D)),
            encoder=dict(layers=enc_layers, norm_g=ones((1, D)), norm_b=zeros((1, D))),
        )
        params["blocks"].append(blk)
    # TODO(synk): the Decoder stack in TimesMaskingBlock.__init__ is never used in forward; omitted.
    return params


# ----------------------------- main -------------------------------------------
if __name__ == "__main__":
    cfg = Configs()
    key = jax.random.PRNGKey(0)
    pkey, xkey, mkey = jax.random.split(key, 3)
    params = init_params(cfg, pkey)
    forward = build_model(cfg)

    x_enc = jax.random.normal(xkey, (2, cfg.window_size, cfg.enc_in), jnp.float32)
    x_mark_enc = jax.random.normal(mkey, (2, cfg.window_size, 4), jnp.float32)

    out = forward(params, x_enc, x_mark_enc)
    out = jax.block_until_ready(out)
    assert out.shape == (2, cfg.pred_len, cfg.c_out), out.shape
    assert bool(jnp.all(jnp.isfinite(out)))
    print("KERNEL_OK")
</pallas_src>

<mosaic_0001>
module attributes {stable_mosaic.version = 11 : i64} {
  func.func @kernel(%arg0: memref<2x16x4xf32, #tpu.memory_space<vmem>>, %arg1: memref<2x16x4xf32, #tpu.memory_space<vmem>>, %arg2: memref<16x32xbf16, #tpu.memory_space<vmem>>, %arg3: memref<16x32xf32, #tpu.memory_space<vmem>>, %arg4: memref<24x16xbf16, #tpu.memory_space<vmem>>, %arg5: memref<24x1xf32, #tpu.memory_space<vmem>>, %arg6: memref<2x24x32xf32, #tpu.memory_space<vmem>>, %arg7: memref<2x1x4xf32, #tpu.memory_space<vmem>>, %arg8: memref<2x1x4xf32, #tpu.memory_space<vmem>>) attributes {dimension_semantics = [], scalar_prefetch = 0 : i64, scratch_operands = 0 : i64, tpu.core_type = #tpu.core_type<tc>} {
    %c0 = arith.constant 0 : index
    %c0_0 = arith.constant 0 : index
    %c0_1 = arith.constant 0 : index
    %0 = vector.load %arg0[%c0, %c0_0, %c0_1] : memref<2x16x4xf32, #tpu.memory_space<vmem>>, vector<2x16x4xf32>
    %cst = arith.constant dense<0.000000e+00> : vector<2x4xf32>
    %1 = vector.multi_reduction <add>, %0, %cst [1] : vector<2x16x4xf32> to vector<2x4xf32>
    %2 = vector.shape_cast %1 : vector<2x4xf32> to vector<2x1x4xf32>
    %cst_2 = arith.constant 1.600000e+01 : f32
    %3 = vector.broadcast %cst_2 : f32 to vector<2x1x4xf32>
    %4 = arith.divf %2, %3 : vector<2x1x4xf32>
    %5 = vector.broadcast %4 : vector<2x1x4xf32> to vector<2x16x4xf32>
    %6 = arith.subf %0, %5 : vector<2x16x4xf32>
    %7 = arith.mulf %6, %6 : vector<2x16x4xf32>
    %cst_3 = arith.constant dense<0.000000e+00> : vector<2x4xf32>
    %8 = vector.multi_reduction <add>, %7, %cst_3 [1] : vector<2x16x4xf32> to vector<2x4xf32>
    %9 = vector.shape_cast %8 : vector<2x4xf32> to vector<2x1x4xf32>
    %cst_4 = arith.constant 1.600000e+01 : f32
    %10 = vector.broadcast %cst_4 : f32 to vector<2x1x4xf32>
    %11 = arith.divf %9, %10 : vector<2x1x4xf32>
    %cst_5 = arith.constant 9.99999974E-6 : f32
    %12 = vector.broadcast %cst_5 : f32 to vector<2x1x4xf32>
    %13 = arith.addf %11, %12 : vector<2x1x4xf32>
    %14 = math.sqrt %13 : vector<2x1x4xf32>
    %15 = vector.broadcast %14 : vector<2x1x4xf32> to vector<2x16x4xf32>
    %16 = arith.divf %6, %15 : vector<2x16x4xf32>
    %c0_6 = arith.constant 0 : index
    %c0_7 = arith.constant 0 : index
    %c0_8 = arith.constant 0 : index
    %17 = vector.load %arg7[%c0_6, %c0_7, %c0_8] : memref<2x1x4xf32, #tpu.memory_space<vmem>>, vector<2x1x4xf32>
    tpu.vector_store %arg7[%c0_6, %c0_7, %c0_8], %4 {strides = array<i32>} : memref<2x1x4xf32, #tpu.memory_space<vmem>>, vector<2x1x4xf32>,
    %c0_9 = arith.constant 0 : index
    %c0_10 = arith.constant 0 : index
    %c0_11 = arith.constant 0 : index
    %18 = vector.load %arg8[%c0_9, %c0_10, %c0_11] : memref<2x1x4xf32, #tpu.memory_space<vmem>>, vector<2x1x4xf32>
    tpu.vector_store %arg8[%c0_9, %c0_10, %c0_11], %14 {strides = array<i32>} : memref<2x1x4xf32, #tpu.memory_space<vmem>>, vector<2x1x4xf32>,
    %19 = vector.extract_strided_slice %16 {offsets = [0, 15, 0], sizes = [2, 1, 4], strides = [1, 1, 1]} : vector<2x16x4xf32> to vector<2x1x4xf32>
    %20 = vector.extract_strided_slice %16 {offsets = [0, 0, 0], sizes = [2, 1, 4], strides = [1, 1, 1]} : vector<2x16x4xf32> to vector<2x1x4xf32>
    %21 = tpu.concatenate %19, %16, %20 in 1 : vector<2x1x4xf32>, vector<2x16x4xf32>, vector<2x1x4xf32> -> vector<2x18x4xf32>
    %22 = vector.extract_strided_slice %21 {offsets = [0, 0, 0], sizes = [2, 16, 4], strides = [1, 1, 1]} : vector<2x18x4xf32> to vector<2x16x4xf32>
    %23 = vector.extract_strided_slice %21 {offsets = [0, 1, 0], sizes = [2, 16, 4], strides = [1, 1, 1]} : vector<2x18x4xf32> to vector<2x16x4xf32>
    %24 = vector.extract_strided_slice %21 {offsets = [0, 2, 0], sizes = [2, 16, 4], strides = [1, 1, 1]} : vector<2x18x4xf32> to vector<2x16x4xf32>
    %25 = tpu.concatenate %22, %23, %24 in 2 : vector<2x16x4xf32>, vector<2x16x4xf32>, vector<2x16x4xf32> -> vector<2x16x12xf32>
    %c0_12 = arith.constant 0 : index
    %c0_13 = arith.constant 0 : index
    %c0_14 = arith.constant 0 : index
    %26 = vector.load %arg1[%c0_12, %c0_13, %c0_14] : memref<2x16x4xf32, #tpu.memory_space<vmem>>, vector<2x16x4xf32>
    %27 = tpu.concatenate %25, %26 in 2 : vector<2x16x12xf32>, vector<2x16x4xf32> -> vector<2x16x16xf32>
    %28 = vector.shape_cast %27 : vector<2x16x16xf32> to vector<32x16xf32>
    %29 = arith.truncf %28 : vector<32x16xf32> to vector<32x16xbf16>
    %c0_15 = arith.constant 0 : index
    %c0_16 = arith.constant 0 : index
    %30 = vector.load %arg2[%c0_15, %c0_16] : memref<16x32xbf16, #tpu.memory_space<vmem>>, vector<16x32xbf16>
    %cst_17 = arith.constant dense<0.000000e+00> : vector<32x32xf32>
    %31 = tpu.matmul %29, %30, %cst_17 {dimension_numbers = #tpu.dot_dimension_numbers<[1], [0], [0], [1], [0, 0, 1, 1], [], []>} : vector<32x16xbf16>, vector<16x32xbf16>, vector<32x32xf32> -> vector<32x32xf32>
    %32 = vector.shape_cast %31 : vector<32x32xf32> to vector<2x16x32xf32>
    %c0_18 = arith.constant 0 : index
    %c0_19 = arith.constant 0 : index
    %33 = vector.load %arg3[%c0_18, %c0_19] : memref<16x32xf32, #tpu.memory_space<vmem>>, vector<16x32xf32>
    %34 = vector.shape_cast %33 : vector<16x32xf32> to vector<1x16x32xf32>
    %35 = vector.broadcast %34 : vector<1x16x32xf32> to vector<2x16x32xf32>
    %36 = arith.addf %32, %35 : vector<2x16x32xf32>
    %c0_20 = arith.constant 0 : index
    %c0_21 = arith.constant 0 : index
    %37 = vector.load %arg4[%c0_20, %c0_21] : memref<24x16xbf16, #tpu.memory_space<vmem>>, vector<24x16xbf16>
    %38 = vector.extract_strided_slice %36 {offsets = [0, 0, 0], sizes = [1, 16, 32], strides = [1, 1, 1]} : vector<2x16x32xf32> to vector<1x16x32xf32>
    %39 = vector.shape_cast %38 : vector<1x16x32xf32> to vector<16x32xf32>
    %40 = arith.truncf %39 : vector<16x32xf32> to vector<16x32xbf16>
    %cst_22 = arith.constant dense<0.000000e+00> : vector<24x32xf32>
    %41 = tpu.matmul %37, %40, %cst_22 {dimension_numbers = #tpu.dot_dimension_numbers<[1], [0], [0], [1], [0, 0, 1, 1], [], []>} : vector<24x16xbf16>, vector<16x32xbf16>, vector<24x32xf32> -> vector<24x32xf32>
    %c0_23 = arith.constant 0 : index
    %c0_24 = arith.constant 0 : index
    %42 = vector.load %arg5[%c0_23, %c0_24] : memref<24x1xf32, #tpu.memory_space<vmem>>, vector<24x1xf32>
    %43 = vector.broadcast %42 : vector<24x1xf32> to vector<24x32xf32>
    %44 = arith.addf %41, %43 : vector<24x32xf32>
    %45 = vector.extract_strided_slice %36 {offsets = [1, 0, 0], sizes = [1, 16, 32], strides = [1, 1, 1]} : vector<2x16x32xf32> to vector<1x16x32xf32>
    %46 = vector.shape_cast %45 : vector<1x16x32xf32> to vector<16x32xf32>
    %47 = arith.truncf %46 : vector<16x32xf32> to vector<16x32xbf16>
    %cst_25 = arith.constant dense<0.000000e+00> : vector<24x32xf32>
    %48 = tpu.matmul %37, %47, %cst_25 {dimension_numbers = #tpu.dot_dimension_numbers<[1], [0], [0], [1], [0, 0, 1, 1], [], []>} : vector<24x16xbf16>, vector<16x32xbf16>, vector<24x32xf32> -> vector<24x32xf32>
    %c0_26 = arith.constant 0 : index
    %c0_27 = arith.constant 0 : index
    %49 = vector.load %arg5[%c0_26, %c0_27] : memref<24x1xf32, #tpu.memory_space<vmem>>, vector<24x1xf32>
    %50 = vector.broadcast %49 : vector<24x1xf32> to vector<24x32xf32>
    %51 = arith.addf %48, %50 : vector<24x32xf32>
    %52 = vector.shape_cast %44 : vector<24x32xf32> to vector<1x24x32xf32>
    %53 = vector.shape_cast %51 : vector<24x32xf32> to vector<1x24x32xf32>
    %54 = tpu.concatenate %52, %53 in 0 : vector<1x24x32xf32>, vector<1x24x32xf32> -> vector<2x24x32xf32>
    %c0_28 = arith.constant 0 : index
    %c0_29 = arith.constant 0 : index
    %c0_30 = arith.constant 0 : index
    %55 = vector.load %arg6[%c0_28, %c0_29, %c0_30] : memref<2x24x32xf32, #tpu.memory_space<vmem>>, vector<2x24x32xf32>
    tpu.vector_store %arg6[%c0_28, %c0_29, %c0_30], %54 {strides = array<i32>} : memref<2x24x32xf32, #tpu.memory_space<vmem>>, vector<2x24x32xf32>,
    return
  }
}

</mosaic_0001>

<bundles_post_ra>
// kernel: prologue.1
= control target key start
LH: loop header
LB: loop body
LE: loop exit
PB: predicated region body
PF: predicated region fallthrough
CT: control target
= control target key end

     0   :  { %14 = vsyncpa [#allocation3], 0  ;;  %vm33_vm0 = vcmask 31744   ;;  %s792_s0 = inlined_call_operand.vmem [shape: f32[2,16,4], index: 0, kind: input, shape index: {}]   ;;  %s793_s1 = inlined_call_operand.vmem [shape: f32[2,16,4], index: 1, kind: input, shape index: {}]   ;;  %s794_s2 = inlined_call_operand.vmem [shape: bf16[16,32], index: 2, kind: input, shape index: {}]   ;;  %s795_s3 = inlined_call_operand.vmem [shape: f32[16,32], index: 3, kind: input, shape index: {}]   ;;  %s796_s4 = inlined_call_operand.vmem [shape: bf16[24,16], index: 4, kind: input, shape index: {}]   ;;  %s797_s5 = inlined_call_operand.vmem [shape: f32[24,1], index: 5, kind: input, shape index: {}]   ;;  %s798_s6 = inlined_call_operand.hbm [shape: f32[2,24,32], index: 6, kind: output, shape index: {0}]   ;;  %s799_s7 = inlined_call_operand.hbm [shape: f32[2,1,4], index: 7, kind: output, shape index: {1}]   ;;  %s800_s8 = inlined_call_operand.hbm [shape: f32[2,1,4], index: 8, kind: output, shape index: {2}]  }
   0x1   :  { %v29_v0 = vld [vmem:[%s792_s0] sm:$0xff]  ;;  %v30_v1 = vld [vmem:[%s792_s0 + $0x8] sm:$0xff]  ;;  %v31_v4 = vld [vmem:[%s792_s0 + $0x10] sm:$0xff] }
   0x2   :  { %v34_v2 = vsel %vm33_vm0, %v29_v0, 0.0  ;;  %v35_v3 = vsel %vm33_vm0, %v30_v1, 0.0  ;;  %v32_v5 = vld [vmem:[%s792_s0 + $0x18] sm:$0xff]  ;;  %v43_v7 = vsel %vm33_vm0, %v31_v4, 0.0 }
   0x3   :  { %v36_v6 = vadd.f32 %v35_v3, %v34_v2  ;;  %v44_v8 = vsel %vm33_vm0, %v32_v5, 0.0 }
   0x4   :  { %v45_v9 = vadd.f32 %v44_v8, %v43_v7 }
   0x5   :  { %v37_v10 = vrot.slane %v36_v6, 4 }
   0x6   :  { %v46_v11 = vrot.slane %v45_v9, 4 }
   0x7   :  { %15 = vsyncpa [#allocation5], 0  ;;  %v38_v12 = vadd.f32 %v37_v10, %v36_v6  ;;  %vm118_vm5 = vcmask 1040384   ;;  %vm152_vm6 = vcmask 1045504   ;;  %vm131_vm7 = vcmask 1046528   ;;  %s620_s14 = smov 4  }
   0x8   :  { %v47_v13 = vadd.f32 %v46_v11, %v45_v9  ;;  %s621_s23 = smov 12   ;;  %vm177_vm8 = vcmask 64512   ;;  %vm202_vm9 = vcmask 97280   ;;  %vm217_vm10 = vcmask 130048  }
   0x9   :  { %v39_v14 = vrot.slane %v38_v12, 2  ;;  %vm105_vm11 = vcmask 24576  }
   0xa   :  { %v48_v15 = vrot.slane %v47_v13, 2 }
   0xb   :  { %v40_v16 = vadd.f32 %v39_v14, %v38_v12 }
   0xc   :  { %v49_v17 = vadd.f32 %v48_v15, %v47_v13 }
   0xd   :  { %v41_v18 = vrot.slane %v40_v16, 1 }
   0xe   :  { %v50_v19 = vrot.slane %v49_v17, 1 }
   0xf   :  { %v42_v20 = vadd.f32 %v41_v18, %v40_v16  ;;  %v544_v16 = vld [vmem:[%s794_s2] sm:$0xff]   ;;  %s619_s2 = smov 8  }
  0x10   :  { %v51_v21 = vadd.f32 %v50_v19, %v49_v17  ;;  %484 = vmatprep.subr.bf16.mxu0 %v544_v16 }
  0x11   :  { %v690_v22 = vmul.f32 0.0625, %v42_v20  ;;  %485 = vmatpush3.bf16.msra.mxu0 %v544_v16  ;;  %v622_v16 = vmov 0  }
  0x12   :  { %v692_v23 = vmul.f32 0.0625, %v51_v21  ;;  %543 = vset.pattern.permute.xlu1 %v622_v16  ;;  %542 = vset.pattern.permute.xlu0 %v622_v16 }
  0x13   :  { %v55_v24 = vsub.f32 %v29_v0, %v690_v22  ;;  %v56_v25 = vsub.f32 %v30_v1, %v690_v22  ;;  %106 = vst.msk [vmem:[#allocation4] sm:$0x1] %vm105_vm11, %v690_v22 }
  0x14   :  { %v57_v26 = vsub.f32 %v31_v4, %v692_v23  ;;  %v58_v27 = vsub.f32 %v32_v5, %v692_v23  ;;  %107 = vst.msk [vmem:[#allocation4 + $0x1] sm:$0x1] %vm105_vm11, %v692_v23 }
  0x15   :  { %v59_v28 = vmul.f32 %v55_v24, %v55_v24  ;;  %v60_v29 = vmul.f32 %v56_v25, %v56_v25 }
  0x16   :  { %v61_v30 = vmul.f32 %v57_v26, %v57_v26  ;;  %v62_v31 = vmul.f32 %v58_v27, %v58_v27 }
  0x17   :  { %v63_v32 = vsel %vm33_vm0, %v59_v28, 0.0  ;;  %v64_v33 = vsel %vm33_vm0, %v60_v29, 0.0 }
  0x18   :  { %v65_v34 = vadd.f32 %v64_v33, %v63_v32  ;;  %v72_v35 = vsel %vm33_vm0, %v61_v30, 0.0  ;;  %v73_v36 = vsel %vm33_vm0, %v62_v31, 0.0  ;;  %v184_v33 = vld [vmem:[%s793_s1 + $0x10] sm:$0xff] }
  0x19   :  { %v74_v37 = vadd.f32 %v73_v36, %v72_v35 }
  0x1a   :  { %v66_v38 = vrot.slane %v65_v34, 4 }
  0x1b   :  { %v75_v39 = vrot.slane %v74_v37, 4 }
  0x1c   :  { %v67_v40 = vadd.f32 %v66_v38, %v65_v34  ;;  %v182_v38 = vld [vmem:[%s793_s1] sm:$0xff] }
  0x1d   :  { %v76_v41 = vadd.f32 %v75_v39, %v74_v37  ;;  %v185_v37 = vld [vmem:[%s793_s1 + $0x18] sm:$0xff]  ;;  %v183_v39 = vld [vmem:[%s793_s1 + $0x8] sm:$0xff] }
  0x1e   :  { %v68_v42 = vrot.slane %v67_v40, 2 }
  0x1f   :  { %v77_v43 = vrot.slane %v76_v41, 2 }
  0x20   :  { %v69_v44 = vadd.f32 %v68_v42, %v67_v40  ;;  %v522_v42 = vpack.i.bf16 %v183_v39, %v182_v38 }
  0x21   :  { %v78_v45 = vadd.f32 %v77_v43, %v76_v41  ;;  %v537_v41 = vpack.i.bf16 %v185_v37, %v184_v33 }
  0x22   :  { %v70_v46 = vrot.slane %v69_v44, 1 }
  0x23   :  { %v79_v47 = vrot.slane %v78_v45, 1 }
  0x24   :  { %v71_v48 = vadd.f32 %v70_v46, %v69_v44 }
  0x25   :  { %v80_v49 = vadd.f32 %v79_v47, %v78_v45 }
  0x26   :  { %v81_v50 = vmul.f32 0.0625, %v71_v48 }
  0x27   :  { %v82_v51 = vmul.f32 0.0625, %v80_v49 }
  0x28   :  { %v83_v52 = vadd.f32 1e-05, %v81_v50 }
  0x29   :  { %v84_v53 = vadd.f32 1e-05, %v82_v51 }
  0x2a   :  { %547 = vrsqrt.f32 %v83_v52  ;;  %vm87_vm1 = vcmp.eq.f32.partialorder %v83_v52, inf  ;;  %v90_v55 = vand.u32 2147483648, %v83_v52  ;;  %vm89_vm2 = vcmp.eq.f32.partialorder %v83_v52, 0.0 }
  0x2b   :  { %549 = vrsqrt.f32 %v84_v53  ;;  %vm94_vm3 = vcmp.eq.f32.partialorder %v84_v53, inf  ;;  %v97_v58 = vand.u32 2147483648, %v84_v53  ;;  %vm96_vm4 = vcmp.eq.f32.partialorder %v84_v53, 0.0 }
  0x37   :  { %v548_v54 = vpop.eup %547 }
  0x38   :  { %v550_v56 = vpop.eup %549  ;;  %v86_v57 = vmul.f32 %v548_v54, %v83_v52 }
  0x39   :  { %v93_v59 = vmul.f32 %v550_v56, %v84_v53 }
  0x3a   :  { %v88_v60 = vsel %vm87_vm1, %v83_v52, %v86_v57 }
  0x3b   :  { %v702_v61 = vsel %vm89_vm2, %v90_v55, %v88_v60  ;;  %v95_v62 = vsel %vm94_vm3, %v84_v53, %v93_v59 }
  0x3c   :  { %551 = vrcp.f32 %v702_v61  ;;  %v705_v63 = vsel %vm96_vm4, %v97_v58, %v95_v62  ;;  %108 = vst.msk [vmem:[#allocation6] sm:$0x1] %vm105_vm11, %v702_v61 }
  0x3d   :  { %553 = vrcp.f32 %v705_v63  ;;  %109 = vst.msk [vmem:[#allocation6 + $0x1] sm:$0x1] %vm105_vm11, %v705_v63 }
  0x49   :  { %v552_v0 = vpop.eup %551 }
  0x4a   :  { %v554_v1 = vpop.eup %553  ;;  %v100_v2 = vmul.f32 %v552_v0, %v55_v24  ;;  %v101_v3 = vmul.f32 %v552_v0, %v56_v25 }
  0x4b   :  { %v103_v4 = vmul.f32 %v554_v1, %v57_v26  ;;  %v104_v5 = vmul.f32 %v554_v1, %v58_v27 }
  0x4c   :  { %v112_v6 = vrot.slane %v101_v3, 7  ;;  %v119_v7 = vrot.slane %v100_v2, 7 }
  0x4d   :  { %v113_v8 = vrot.slane %v104_v5, 7  ;;  %v121_v9 = vrot.slane %v103_v4, 7 }
  0x4e   :  { %v120_v10 = vsel %vm118_vm5, %v119_v7, %v112_v6  ;;  %v127_v11 = vsel %vm118_vm5, %v112_v6, %v119_v7 }
  0x4f   :  { %v153_v12 = vrot.slane %v127_v11, 2  ;;  %v154_v13 = vrot.slane %v120_v10, 2  ;;  %v132_v14 = vrot.slane %v127_v11, 1  ;;  %v133_v15 = vrot.slane %v120_v10, 1 }
  0x50   :  { %v122_v17 = vsel %vm118_vm5, %v121_v9, %v113_v8  ;;  %v128_v18 = vsel %vm118_vm5, %v113_v8, %v121_v9 }
  0x51   :  { %v155_v19 = vsel %vm152_vm6, %v153_v12, %v154_v13  ;;  %v156_v20 = vsel %vm152_vm6, %v154_v13, %v153_v12  ;;  %v134_v21 = vsel %vm131_vm7, %v132_v14, %v133_v15  ;;  %v135_v24 = vsel %vm131_vm7, %v133_v15, %v132_v14  ;;  %v545_v13 = vld [vmem:[%s796_s4] sm:$0xff]   ;;  %v284_v14 = vld [vmem:[%s797_s5 + $0x8] sm:$0xff] }
  0x52   :  { %v527_v25 = vpack.i.bf16 %v156_v20, %v155_v19  ;;  %v512_v26 = vpack.i.bf16 %v135_v24, %v134_v21  ;;  %v157_v27 = vrot.slane %v128_v18, 2  ;;  %v158_v28 = vrot.slane %v122_v17, 2  ;;  %492 = vmatprep.mubr.msk.bf16.mxu1 %vm217_vm10, %v545_v13  ;;  %v283_v15 = vld [vmem:[%s797_s5] sm:$0xff]  ;;  %v274_v21 = vld [vmem:[%s795_s3 + $0x8] sm:$0xff] }
  0x53   :  { %v136_v29 = vrot.slane %v128_v18, 1  ;;  %v137_v30 = vrot.slane %v122_v17, 1  ;;  %v273_v19 = vld [vmem:[%s795_s3] sm:$0xff]  ;;  %s623_s3 = smov [#allocation4]  }
  0x54   :  { %528 = vrot.lane.b32.xlu1 %v527_v25, %s619_s2  ;;  %513 = vrot.lane.b32.xlu0 %v512_v26, %s620_s14  ;;  %v159_v31 = vsel %vm152_vm6, %v157_v27, %v158_v28  ;;  %v160_v32 = vsel %vm152_vm6, %v158_v28, %v157_v27  ;;  %s436_s13 = sshll.u32 %s623_s3, 4  ;;  %s437_s13 = int_to_ptr.vmem [resolvable:$true] %s436_s13 }
  0x55   :  { %v532_v34 = vpack.i.bf16 %v160_v32, %v159_v31  ;;  %v138_v35 = vsel %vm131_vm7, %v136_v29, %v137_v30  ;;  %v139_v36 = vsel %vm131_vm7, %v137_v30, %v136_v29  ;;  %v546_v32 = vld [vmem:[%s796_s4 + $0x8] ss:$0 sps:$4 sm:$0xff]   ;;  %s555_s4 = scalar_lea.vmem %s437_s13, 32  ;;  %p560_p1 = scmp.lt.s32.totalorder %s437_s13, %s437_s13 }
  0x56   :  { %v517_v40 = vpack.i.bf16 %v139_v36, %v138_v35  ;;  %p556_p0 = scmp.ne.s32.totalorder %s437_s13, %s555_s4  ;;  %p561_p2 = scmp.lt.s32.totalorder %s555_s4, %s555_s4 }
  0x58   :  { %533 = vrot.lane.b32.xlu1 %v532_v34, %s619_s2  ;;  %518 = vrot.lane.b32.xlu0 %v517_v40, %s620_s14  ;;  %p562_p3 = por %p561_p2, %p560_p1 }
  0x5a   :  { %p563_p4 = pnand %p562_p3, %p556_p0 }
  0x5c   :  { %538 = vrot.lane.b32.xlu1 %v537_v41, %s621_s23  ;;  %523 = vrot.lane.b32.xlu0 %v522_v42, %s621_s23 }
  0x60   :  { %293 = vperm.xlu1 %543, %v284_v14   ;;  %288 = vperm.xlu0 %542, %v283_v15  }
  0xc6   :  { %v529_v43 = vpop.permute.xlu1 %528  ;;  %v514_v44 = vpop.permute.xlu0 %513 }
  0xc7   :  { %v516_v45 = vunpack.i.h.bf16 %v514_v44  ;;  %v515_v46 = vunpack.i.l.bf16 %v514_v44  ;;  %v531_v51 = vunpack.i.h.bf16 %v529_v43  ;;  %v530_v52 = vunpack.i.l.bf16 %v529_v43 }
  0xc9   :  { %v174_v55 = vsel %vm33_vm0, %v120_v10, %v516_v45  ;;  %v173_v56 = vsel %vm33_vm0, %v127_v11, %v515_v46 }
  0xca   :  { %v534_v47 = vpop.permute.xlu1 %533  ;;  %v519_v48 = vpop.permute.xlu0 %518  ;;  %v178_v5 = vsel %vm177_vm8, %v173_v56, %v530_v52  ;;  %v179_v6 = vsel %vm177_vm8, %v174_v55, %v531_v51 }
  0xcb   :  { %v521_v49 = vunpack.i.h.bf16 %v519_v48  ;;  %v520_v50 = vunpack.i.l.bf16 %v519_v48  ;;  %v536_v53 = vunpack.i.h.bf16 %v534_v47  ;;  %v535_v54 = vunpack.i.l.bf16 %v534_v47 }
  0xcd   :  { %v176_v57 = vsel %vm33_vm0, %v122_v17, %v521_v49  ;;  %v175_v58 = vsel %vm33_vm0, %v128_v18, %v520_v50  ;;  %v285_v17 = vld [vmem:[%s797_s5 + $0x10] sm:$0xff] }
  0xce   :  { %v539_v59 = vpop.permute.xlu1 %538  ;;  %v524_v60 = vpop.permute.xlu0 %523  ;;  %v180_v3 = vsel %vm177_vm8, %v175_v58, %v535_v54  ;;  %v181_v4 = vsel %vm177_vm8, %v176_v57, %v536_v53  ;;  %298 = vperm.xlu1 %543, %v285_v17  }
  0xcf   :  { %v541_v62 = vunpack.i.h.bf16 %v539_v59  ;;  %v540_v0 = vunpack.i.l.bf16 %v539_v59  ;;  %v526_v1 = vunpack.i.h.bf16 %v524_v60  ;;  %v525_v2 = vunpack.i.l.bf16 %v524_v60 }
  0xd1   :  { %v205_v7 = vsel %vm202_vm9, %v180_v3, %v540_v0  ;;  %v206_v8 = vsel %vm202_vm9, %v181_v4, %v541_v62  ;;  %v203_v9 = vsel %vm202_vm9, %v178_v5, %v525_v2  ;;  %v204_v10 = vsel %vm202_vm9, %v179_v6, %v526_v1 }
  0xd2   :  { %v208_v11 = vpack.c.bf16 %v206_v8, %v205_v7  ;;  %v207_v12 = vpack.c.bf16 %v204_v10, %v203_v9 }
  0xd4   :  { %486 = vmatprep.mubr.msk.bf16.mxu0 %vm217_vm10, %v207_v12 }
  0xd5   :  { %487 = vmatmul.mubr.msk.bf16.vlgmr.msra.gmra.mxu0 %vm217_vm10, %v208_v11 }
  0xd6   :  { %498 = vmatprep.mubr.msk.bf16.mxu0 %vm217_vm10, %v545_v13 }
 0x195   :  { %v488_v18 = vpop.f32.mrf.mxu0 }
 0x196   :  { %v277_v25 = vadd.f32 %v488_v18, %v273_v19 }
 0x197   :  { %v258_v20 = vpop.f32.mrf.mxu0 }
 0x198   :  { %v275_v28 = vadd.f32 %v273_v19, %v258_v20 }
 0x199   :  { %v489_v24 = vpop.f32.mrf.mxu0 }
 0x19a   :  { %v278_v26 = vadd.f32 %v489_v24, %v274_v21 }
 0x19b   :  { %v261_v27 = vpop.f32.mrf.mxu0 }
 0x19c   :  { %v363_v29 = vpack.c.bf16 %v278_v26, %v277_v25  ;;  %v276_v30 = vadd.f32 %v274_v21, %v261_v27 }
 0x19e   :  { %496 = vmatprep.subr.bf16.mxu0 %v363_v29  ;;  %v282_v31 = vpack.c.bf16 %v276_v30, %v275_v28 }
 0x19f   :  { %497 = vmatpush3.bf16.msra.mxu0 %v363_v29 }
 0x1a0   :  { %490 = vmatprep.subr.bf16.mxu1 %v282_v31 }
 0x1a1   :  { %491 = vmatpush3.bf16.msra.mxu1 %v282_v31 }
 0x1a2   :  { %499 = vmatmul.mubr.msk.bf16.vlgmr.msra.gmra.mxu0 %vm217_vm10, %v546_v32 }
 0x1a4   :  { %493 = vmatmul.mubr.msk.bf16.vlgmr.msra.gmra.mxu1 %vm217_vm10, %v546_v32 }
 0x1a5   :  { %566 = shalt.err (!%p563_p4)
}
 0x1a6   :  { %s624_s14 = smov 16   ;;  %s625_s15 = smov 1  }
 0x1a7   :  { %442 = dma.vmem_to_hbm [thread:$0]  %s437_s13, 32, %s799_s7, [#allocation5], %s624_s14, %s624_s14, %s625_s15  }
 0x1a8   :  { %s626_s18 = smov [#allocation6]  }
 0x1a9   :  { %s448_s19 = sshll.u32 %s626_s18, 4  ;;  %s449_s19 = int_to_ptr.vmem [resolvable:$true] %s448_s19 }
 0x1aa   :  { %s575_s20 = scalar_lea.vmem %s449_s19, 32  ;;  %p580_p6 = scmp.lt.s32.totalorder %s449_s19, %s449_s19 }
 0x1ab   :  { %p576_p5 = scmp.ne.s32.totalorder %s449_s19, %s575_s20  ;;  %p581_p7 = scmp.lt.s32.totalorder %s575_s20, %s575_s20 }
 0x1ad   :  { %p582_p8 = por %p581_p7, %p580_p6 }
 0x1af   :  { %p583_p9 = pnand %p582_p8, %p576_p5 }
 0x1b1   :  { %586 = shalt.err (!%p583_p9)
}
 0x1b2   :  { %454 = dma.vmem_to_hbm [thread:$0]  %s449_s19, 32, %s800_s8, [#allocation5], %s624_s14, %s624_s14, %s625_s15   ;;  %v294_v22 = vpop.permute.xlu1 %293  ;;  %vm412_vm12 = vcmask 261120   ;;  %v289_v63 = vpop.permute.xlu0 %288 }
 0x1b3   :  { %s627_s7 = smov [#allocation2]  }
 0x1b4   :  { %s424_s8 = sshll.u32 %s627_s7, 4  ;;  %s425_s8 = int_to_ptr.vmem [resolvable:$true] %s424_s8 }
 0x1b5   :  { %s595_s23 = scalar_lea.vmem %s425_s8, 768  ;;  %p600_p11 = scmp.lt.s32.totalorder %s425_s8, %s425_s8 }
 0x1b6   :  { %v299_v23 = vpop.permute.xlu1 %298  ;;  %p596_p10 = scmp.ne.s32.totalorder %s425_s8, %s595_s23  ;;  %p601_p12 = scmp.lt.s32.totalorder %s595_s23, %s595_s23 }
 0x1b8   :  { %p602_p13 = por %p601_p12, %p600_p11 }
 0x1ba   :  { %p603_p0 = pnand %p602_p13, %p596_p10 }
 0x262   :  { %v500_v61 = vpop.f32.mrf.mxu0 }
 0x263   :  { %v407_v33 = vadd.f32 %v500_v61, %v299_v23 }
 0x264   :  { %v494_v34 = vpop.f32.mrf.mxu1  ;;  %v398_v35 = vpop.f32.mrf.mxu0 }
 0x265   :  { %v358_v36 = vadd.f32 %v494_v34, %v299_v23  ;;  %418 = vst.msk [vmem:[#allocation2 + $0x28] sm:$0xff] %vm412_vm12, %v407_v33  ;;  %v399_v37 = vadd.f32 %v398_v35, %v289_v63 }
 0x266   :  { %v349_v38 = vpop.f32.mrf.mxu1  ;;  %v501_v39 = vpop.f32.mrf.mxu0 }
 0x267   :  { %415 = vst.msk [vmem:[#allocation2 + $0x10] sm:$0xff] %vm412_vm12, %v358_v36  ;;  %v350_v40 = vadd.f32 %v349_v38, %v289_v63  ;;  %416 = vst.msk [vmem:[#allocation2 + $0x18] sm:$0xff] %vm412_vm12, %v399_v37 }
 0x268   :  { %v495_v41 = vpop.f32.mrf.mxu1  ;;  %v401_v42 = vpop.f32.mrf.mxu0 }
 0x269   :  { %413 = vst.msk [vmem:[#allocation2] sm:$0xff] %vm412_vm12, %v350_v40  ;;  %v402_v43 = vadd.f32 %v401_v42, %v294_v22 }
 0x26a   :  { %v352_v44 = vpop.f32.mrf.mxu1 }
 0x26b   :  { %417 = vst.msk [vmem:[#allocation2 + $0x20] sm:$0xff] %vm412_vm12, %v402_v43  ;;  %v353_v45 = vadd.f32 %v352_v44, %v294_v22 }
 0x26d   :  { %414 = vst.msk [vmem:[#allocation2 + $0x8] sm:$0xff] %vm412_vm12, %v353_v45 }
 0x26e   :  { %606 = shalt.err (!%p603_p0)
}
 0x26f   :  { %s628_s1 = smov 128  }
 0x270   :  { %430 = dma.vmem_to_hbm [thread:$0]  %s425_s8, 768, %s798_s6, [#allocation3], %s628_s1, %s628_s1, %s619_s2  }
 0x271   :  { %615 = dma.done.wait [#allocation3], 768  }
 0x272   :  { %616 = vsyncadd [#allocation3], 4294966528 }
 0x273   :  { %617 = dma.done.wait [#allocation5], 64  }
 0x274   :  { %618 = vsyncadd [#allocation5], 4294967232 }
 0x275   :  { %464 = vsyncpa [#allocation3], 1 }
 0x276   :  { %465 = vsyncpa [#allocation5], 1 }

</bundles_post_ra>
